<compile_context>
chip_gen: v7x
topology: tpu7x:2x2x1
jax: 0.10.0
libtpu: 0.0.40
codegen_flags: <defaults>
</compile_context>

<pallas_src>
import functools
import math

import jax
import jax.numpy as jnp
from jax.experimental import pallas as pl
from jax.experimental.pallas import tpu as pltpu


_HALF_LOG_2PI = 0.5 * math.log(2.0 * math.pi)


def _gaussian_loss_kernel(gt_ref, mu_ref, sp_ref, mask_ref, out_ref, *, min_sigma):
    # Grid = (batch_blocks, feature_blocks); the feature axis is a reduction
    # axis, so the (TB, 1) output block stays resident across it.
    @pl.when(pl.program_id(1) == 0)
    def _init():
        out_ref[...] = jnp.zeros_like(out_ref)

    x = gt_ref[...].astype(jnp.float32)
    mu = mu_ref[...].astype(jnp.float32)
    sp = sp_ref[...].astype(jnp.float32)
    m = mask_ref[...].astype(jnp.float32)

    # softplus (numerically stable) then clamp from below.
    sigma = jnp.maximum(jnp.logaddexp(sp, 0.0), min_sigma)
    inv_sigma = pl.reciprocal(sigma, approx=False)       # EUP, not VALU divide
    log_sigma = jnp.log(sigma)                           # EUP

    # Normal log-prob:  -0.5*((x-mu)/sigma)^2 - log(sigma) - 0.5*log(2*pi)
    z = (x - mu) * inv_sigma
    log_prob = -(0.5 * (z * z) + log_sigma + _HALF_LOG_2PI)

    out_ref[...] += jnp.sum(log_prob * m, axis=-1, keepdims=True)


def _pick_batch_tile(B, cap=64):
    """Full B if small, else the largest multiple of 8 <= cap that divides B."""
    if B <= cap:
        return B
    t = cap - (cap % 8)
    while t >= 8:
        if B % t == 0:
            return t
        t -= 8
    return B  # full extent: always layout-legal


def _pick_feature_tile(F, TB):
    """Feature tile: multiple of 128 dividing F (or full F), sized so the
    double-buffered f32 input blocks (4 arrays x 2 buffers) stay ~<= 12 MiB."""
    max_elems = (12 * 1024 * 1024) // (4 * 2 * 4)  # 4 inputs, 2 buffers, 4 B/elem
    cap = max(128, max_elems // max(TB, 1))
    if F <= cap:
        return F
    if F % 128 != 0:
        return F  # full-extent block is the only layout-legal choice
    t = (cap // 128) * 128
    while t >= 128:
        if F % t == 0:
            return t
        t -= 128
    return F


def gaussian_loss(groundtruth, distr_params, mask, min_sigma=0.01):
    """groundtruth/mask: (B, C, H, W); distr_params: (B, 2C, H, W) -> (B,)"""
    B, C, H, W = groundtruth.shape
    assert distr_params.shape == (B, 2 * C, H, W)
    assert mask.shape == groundtruth.shape

    F = C * H * W
    gt = groundtruth.reshape(B, F)
    mk = mask.reshape(B, F)

    TB = _pick_batch_tile(B)
    TF = _pick_feature_tile(F, TB)
    nb = B // TB
    nf = F // TF

    if F % 128 == 0:
        # Fast path: one (B, 2F) view of distr_params, addressed twice via
        # block-column offsets -> zero extra HBM copies.
        dp = distr_params.reshape(B, 2 * F)
        mu_arg, sp_arg = dp, dp
        mu_spec = pl.BlockSpec((TB, TF), lambda i, k: (i, k))
        sp_spec = pl.BlockSpec((TB, TF), lambda i, k: (i, k + nf))
    else:
        # Fallback for odd feature sizes: wrapper-side split (one extra copy),
        # blocks use the full feature extent so layout stays legal.
        mu_arg = distr_params[:, :C].reshape(B, F)
        sp_arg = distr_params[:, C:].reshape(B, F)
        mu_spec = pl.BlockSpec((TB, TF), lambda i, k: (i, k))
        sp_spec = pl.BlockSpec((TB, TF), lambda i, k: (i, k))

    data_spec = pl.BlockSpec((TB, TF), lambda i, k: (i, k))
    out_spec = pl.BlockSpec((TB, 1), lambda i, k: (i, 0))

    kernel = functools.partial(_gaussian_loss_kernel, min_sigma=float(min_sigma))

    out = pl.pallas_call(
        kernel,
        out_shape=jax.ShapeDtypeStruct((B, 1), jnp.float32),
        grid_spec=pltpu.PrefetchScalarGridSpec(
            num_scalar_prefetch=0,
            grid=(nb, nf),
            in_specs=[data_spec, mu_spec, sp_spec, data_spec],
            out_specs=out_spec,
        ),
        compiler_params=pltpu.CompilerParams(
            dimension_semantics=("parallel", "arbitrary"),
            vmem_limit_bytes=48 * 1024 * 1024,
        ),
    )(gt, mu_arg, sp_arg, mk)
    return out[:, 0]


def _reference(groundtruth, distr_params, mask, min_sigma=0.01):
    B, C = groundtruth.shape[0], groundtruth.shape[1]
    mu = distr_params[:, :C]
    sigma = jnp.maximum(jax.nn.softplus(distr_params[:, C:]), min_sigma)
    z = (groundtruth - mu) / sigma
    logp = -0.5 * z * z - jnp.log(sigma) - 0.5 * jnp.log(2.0 * jnp.pi)
    return (logp * mask).reshape(B, -1).sum(-1)


if __name__ == "__main__":
    key = jax.random.PRNGKey(0)
    k1, k2, k3 = jax.random.split(key, 3)

    B, C, H, W = 2, 4, 16, 16
    groundtruth = jax.random.normal(k1, (B, C, H, W), dtype=jnp.float32)
    distr_params = jax.random.normal(k2, (B, 2 * C, H, W), dtype=jnp.float32)
    mask = (jax.random.uniform(k3, (B, C, H, W)) > 0.5).astype(jnp.float32)

    out = gaussian_loss(groundtruth, distr_params, mask, min_sigma=0.01)
    out = jax.block_until_ready(out)

    ref = _reference(groundtruth, distr_params, mask, min_sigma=0.01)
    assert out.shape == (B,)
    assert jnp.allclose(out, ref, rtol=1e-5, atol=1e-4), (out, ref)

    print("KERNEL_OK")
</pallas_src>

<mosaic_0001>
module attributes {stable_mosaic.version = 11 : i64} {
  func.func @_gaussian_loss_kernel(%arg0: i32, %arg1: i32, %arg2: memref<2x1024xf32, #tpu.memory_space<vmem>>, %arg3: memref<2x1024xf32, #tpu.memory_space<vmem>>, %arg4: memref<2x1024xf32, #tpu.memory_space<vmem>>, %arg5: memref<2x1024xf32, #tpu.memory_space<vmem>>, %arg6: memref<2x1xf32, #tpu.memory_space<vmem>>) attributes {dimension_semantics = [#tpu.dimension_semantics<parallel>, #tpu.dimension_semantics<arbitrary>], iteration_bounds = array<i64: 1, 1>, scalar_prefetch = 0 : i64, scratch_operands = 0 : i64, tpu.core_type = #tpu.core_type<tc>, window_params = [{transform_indices = @transform_0, window_bounds = array<i64: 2, 1024>}, {transform_indices = @transform_1, window_bounds = array<i64: 2, 1024>}, {transform_indices = @transform_2, window_bounds = array<i64: 2, 1024>}, {transform_indices = @transform_3, window_bounds = array<i64: 2, 1024>}, {transform_indices = @transform_4, window_bounds = array<i64: 2, 1>}]} {
    %c0_i32 = arith.constant 0 : i32
    %0 = arith.cmpi eq, %arg1, %c0_i32 : i32
    %1 = arith.extui %0 : i1 to i32
    %c0_i32_0 = arith.constant 0 : i32
    %2 = arith.cmpi ne, %1, %c0_i32_0 : i32
    scf.if %2 {
      %cst_18 = arith.constant 0.000000e+00 : f32
      %41 = vector.broadcast %cst_18 : f32 to vector<2x1xf32>
      %c0_19 = arith.constant 0 : index
      %c0_20 = arith.constant 0 : index
      %42 = vector.load %arg6[%c0_19, %c0_20] : memref<2x1xf32, #tpu.memory_space<vmem>>, vector<2x1xf32>
      tpu.vector_store %arg6[%c0_19, %c0_20], %41 {strides = array<i32>} : memref<2x1xf32, #tpu.memory_space<vmem>>, vector<2x1xf32>,
    } else {
    }
    %c0 = arith.constant 0 : index
    %c0_1 = arith.constant 0 : index
    %3 = vector.load %arg2[%c0, %c0_1] : memref<2x1024xf32, #tpu.memory_space<vmem>>, vector<2x1024xf32>
    %c0_2 = arith.constant 0 : index
    %c0_3 = arith.constant 0 : index
    %4 = vector.load %arg3[%c0_2, %c0_3] : memref<2x1024xf32, #tpu.memory_space<vmem>>, vector<2x1024xf32>
    %c0_4 = arith.constant 0 : index
    %c0_5 = arith.constant 0 : index
    %5 = vector.load %arg4[%c0_4, %c0_5] : memref<2x1024xf32, #tpu.memory_space<vmem>>, vector<2x1024xf32>
    %c0_6 = arith.constant 0 : index
    %c0_7 = arith.constant 0 : index
    %6 = vector.load %arg5[%c0_6, %c0_7] : memref<2x1024xf32, #tpu.memory_space<vmem>>, vector<2x1024xf32>
    %cst = arith.constant 0.000000e+00 : f32
    %7 = vector.broadcast %cst : f32 to vector<2x1024xf32>
    %8 = arith.maximumf %5, %7 : vector<2x1024xf32>
    %9 = vector.broadcast %cst : f32 to vector<2x1024xf32>
    %10 = arith.subf %5, %9 : vector<2x1024xf32>
    %11 = arith.cmpf one, %10, %10 : vector<2x1024xf32>
    %12 = vector.broadcast %cst : f32 to vector<2x1024xf32>
    %13 = arith.addf %5, %12 : vector<2x1024xf32>
    %14 = math.absf %10 : vector<2x1024xf32>
    %cst_8 = arith.constant 0.000000e+00 : f32
    %15 = vector.broadcast %cst_8 : f32 to vector<2x1024xf32>
    %16 = arith.subf %15, %14 : vector<2x1024xf32>
    %17 = math.exp %16 : vector<2x1024xf32>
    %18 = math.log1p %17 : vector<2x1024xf32>
    %19 = arith.addf %8, %18 : vector<2x1024xf32>
    %20 = arith.select %11, %13, %19 : vector<2x1024xi1>, vector<2x1024xf32>
    %cst_9 = arith.constant 0.00999999977 : f32
    %21 = vector.broadcast %cst_9 : f32 to vector<2x1024xf32>
    %22 = arith.maximumf %20, %21 : vector<2x1024xf32>
    %23 = tpu.reciprocal %22 : vector<2x1024xf32> -> vector<2x1024xf32>
    %24 = math.log %22 : vector<2x1024xf32>
    %25 = arith.subf %3, %4 : vector<2x1024xf32>
    %26 = arith.mulf %25, %23 : vector<2x1024xf32>
    %27 = arith.mulf %26, %26 : vector<2x1024xf32>
    %cst_10 = arith.constant 5.000000e-01 : f32
    %28 = vector.broadcast %cst_10 : f32 to vector<2x1024xf32>
    %29 = arith.mulf %28, %27 : vector<2x1024xf32>
    %30 = arith.addf %29, %24 : vector<2x1024xf32>
    %cst_11 = arith.constant 0.918938517 : f32
    %31 = vector.broadcast %cst_11 : f32 to vector<2x1024xf32>
    %32 = arith.addf %30, %31 : vector<2x1024xf32>
    %cst_12 = arith.constant 0.000000e+00 : f32
    %33 = vector.broadcast %cst_12 : f32 to vector<2x1024xf32>
    %34 = arith.subf %33, %32 : vector<2x1024xf32>
    %c0_13 = arith.constant 0 : index
    %c0_14 = arith.constant 0 : index
    %35 = vector.load %arg6[%c0_13, %c0_14] : memref<2x1xf32, #tpu.memory_space<vmem>>, vector<2x1xf32>
    %36 = arith.mulf %34, %6 : vector<2x1024xf32>
    %cst_15 = arith.constant dense<0.000000e+00> : vector<2xf32>
    %37 = vector.multi_reduction <add>, %36, %cst_15 [1] : vector<2x1024xf32> to vector<2xf32>
    %38 = vector.shape_cast %37 : vector<2xf32> to vector<2x1xf32>
    %39 = arith.addf %35, %38 : vector<2x1xf32>
    %c0_16 = arith.constant 0 : index
    %c0_17 = arith.constant 0 : index
    %40 = vector.load %arg6[%c0_16, %c0_17] : memref<2x1xf32, #tpu.memory_space<vmem>>, vector<2x1xf32>
    tpu.vector_store %arg6[%c0_16, %c0_17], %39 {strides = array<i32>} : memref<2x1xf32, #tpu.memory_space<vmem>>, vector<2x1xf32>,
    return
  }
  func.func @transform_0(%arg0: i32, %arg1: i32) -> (i32, i32) {
    %c0_i32 = arith.constant 0 : i32
    return %arg0, %arg1 : i32, i32
  }
  func.func @transform_1(%arg0: i32, %arg1: i32) -> (i32, i32) {
    %c0_i32 = arith.constant 0 : i32
    return %arg0, %arg1 : i32, i32
  }
  func.func @transform_2(%arg0: i32, %arg1: i32) -> (i32, i32) {
    %c1_i32 = arith.constant 1 : i32
    %0 = arith.addi %arg1, %c1_i32 : i32
    %c0_i32 = arith.constant 0 : i32
    return %arg0, %0 : i32, i32
  }
  func.func @transform_3(%arg0: i32, %arg1: i32) -> (i32, i32) {
    %c0_i32 = arith.constant 0 : i32
    return %arg0, %arg1 : i32, i32
  }
  func.func @transform_4(%arg0: i32, %arg1: i32) -> (i32, i32) {
    %c0_i32 = arith.constant 0 : i32
    %c0_i32_0 = arith.constant 0 : i32
    return %arg0, %c0_i32 : i32, i32
  }
}

</mosaic_0001>

<bundles_post_ra>
// kernel: tpu_custom_call.1
= control target key start
LH: loop header
LB: loop body
LE: loop exit
PB: predicated region body
PF: predicated region fallthrough
CT: control target
= control target key end

     0   :  { %9 = vsyncpa [#allocation3], 0  ;;  %s442_s0 = inlined_call_operand.hbm [shape: f32[2,1024], index: 0, kind: input, shape index: {}]   ;;  %s443_s1 = inlined_call_operand.hbm [shape: f32[2,2048], index: 1, kind: input, shape index: {}]   ;;  %s444_s2 = inlined_call_operand.hbm [shape: f32[2,2048], index: 2, kind: input, shape index: {}]   ;;  %s445_s3 = inlined_call_operand.hbm [shape: f32[2,1024], index: 3, kind: input, shape index: {}]   ;;  %s446_s4 = inlined_call_operand.vmem [shape: f32[2,1], index: 4, kind: output, shape index: {}]  }
   0x1   :  { %10 = vsyncpa [#allocation5], 0 }
   0x2   :  { %11 = vsyncpa [#allocation8], 0  ;;  %s337_s15 = smov [#allocation4]   ;;  %s338_s17 = smov [#allocation2]  }
   0x3   :  { %s28_s16 = sshll.u32 %s337_s15, 4  ;;  %s18_s18 = sshll.u32 %s338_s17, 4  ;;  %s29_s16 = int_to_ptr.vmem [resolvable:$true] %s28_s16  ;;  %s368_s18 = int_to_ptr.vmem [resolvable:$true] %s18_s18 }
   0x4   :  { %s240_s21 = scalar_lea.hbm %s443_s1, 256  ;;  %s242_s26 = scalar_lea.hbm %s443_s1, 512 }
   0x5   :  { %p241_p0 = scmp.ne.s32.totalorder %s443_s1, %s240_s21  ;;  %p243_p1 = scmp.lt.u32.totalorder %s242_s26, %s240_s21 }
   0x6   :  { %p244_p2 = scmp.lt.u32.totalorder %s240_s21, %s443_s1 }
   0x8   :  { %p245_p3 = por %p244_p2, %p243_p1 }
   0xa   :  { %p246_p4 = pnand %p245_p3, %p241_p0 }
   0xc   :  { %249 = shalt.err (!%p246_p4)
}
   0xd   :  { %s250_s29 = scalar_lea.vmem %s29_s16, 256  ;;  %p255_p6 = scmp.lt.s32.totalorder %s29_s16, %s29_s16 }
   0xe   :  { %p251_p5 = scmp.ne.s32.totalorder %s29_s16, %s250_s29  ;;  %p256_p7 = scmp.lt.s32.totalorder %s250_s29, %s250_s29 }
  0x10   :  { %p257_p8 = por %p256_p7, %p255_p6 }
  0x12   :  { %p258_p9 = pnand %p257_p8, %p251_p5 }
  0x14   :  { %261 = shalt.err (!%p258_p9)
}
  0x15   :  { %31 = dma.hbm_to_vmem [thread:$0]  %s443_s1, 256, %s29_s16, [#allocation5]  }
  0x16   :  { %s262_s8 = scalar_lea.hbm %s442_s0, 256 }
  0x17   :  { %p263_p10 = scmp.ne.s32.totalorder %s442_s0, %s262_s8  ;;  %p266_p11 = scmp.lt.u32.totalorder %s262_s8, %s442_s0 }
  0x19   :  { %p268_p12 = pnand %p266_p11, %p263_p10 }
  0x1b   :  { %271 = shalt.err (!%p268_p12)
}
  0x1c   :  { %s272_s13 = scalar_lea.vmem %s368_s18, 256  ;;  %p277_p0 = scmp.lt.s32.totalorder %s368_s18, %s368_s18 }
  0x1d   :  { %p273_p13 = scmp.ne.s32.totalorder %s368_s18, %s272_s13  ;;  %p278_p1 = scmp.lt.s32.totalorder %s272_s13, %s272_s13 }
  0x1f   :  { %p279_p2 = por %p278_p1, %p277_p0 }
  0x21   :  { %p280_p3 = pnand %p279_p2, %p273_p13 }
  0x23   :  { %283 = shalt.err (!%p280_p3)
}
  0x24   :  { %21 = dma.hbm_to_vmem [thread:$0]  %s442_s0, 256, %s368_s18, [#allocation3]  }
  0x25   :  { %s217_s17 = scalar_lea.hbm %s444_s2, 256  ;;  %s339_s19 = smov [#allocation6]  }
  0x26   :  { %s42_s20 = sshll.u32 %s339_s19, 4  ;;  %s340_s21 = smov [#allocation7]   ;;  %s43_s20 = int_to_ptr.vmem [resolvable:$true] %s42_s20 }
  0x27   :  { %s52_s22 = sshll.u32 %s340_s21, 4  ;;  %s308_s25 = scalar_lea.hbm %s444_s2, 512  ;;  %s53_s22 = int_to_ptr.vmem [resolvable:$true] %s52_s22 }
  0x28   :  { %p285_p4 = scmp.ne.s32.totalorder %s217_s17, %s308_s25  ;;  %p287_p5 = scmp.lt.u32.totalorder %s217_s17, %s444_s2 }
  0x29   :  { %p288_p6 = scmp.lt.u32.totalorder %s308_s25, %s308_s25  ;;  %p290_p8 = scmp.lt.u32.totalorder %s308_s25, %s217_s17 }
  0x2b   :  { %p289_p7 = por %p288_p6, %p287_p5 }
  0x2d   :  { %p291_p9 = por %p290_p8, %p289_p7 }
  0x2f   :  { %p292_p10 = pnand %p291_p9, %p285_p4 }
  0x31   :  { %295 = shalt.err (!%p292_p10)
}
  0x32   :  { %s296_s0 = scalar_lea.vmem %s43_s20, 256  ;;  %p301_p12 = scmp.lt.s32.totalorder %s43_s20, %s43_s20 }
  0x33   :  { %p297_p11 = scmp.ne.s32.totalorder %s43_s20, %s296_s0  ;;  %p302_p13 = scmp.lt.s32.totalorder %s296_s0, %s296_s0 }
  0x35   :  { %p303_p0 = por %p302_p13, %p301_p12 }
  0x37   :  { %p304_p1 = pnand %p303_p0, %p297_p11 }
  0x39   :  { %307 = shalt.err (!%p304_p1)
}
  0x3a   :  { %45 = dma.hbm_to_vmem [thread:$0]  %s217_s17, 256, %s43_s20, [#allocation5]  }
  0x3b   :  { %s309_s29 = scalar_lea.hbm %s445_s3, 256 }
  0x3c   :  { %p310_p2 = scmp.ne.s32.totalorder %s445_s3, %s309_s29  ;;  %p313_p3 = scmp.lt.u32.totalorder %s309_s29, %s445_s3 }
  0x3e   :  { %p315_p4 = pnand %p313_p3, %p310_p2 }
  0x40   :  { %318 = shalt.err (!%p315_p4)
}
  0x41   :  { %s319_s7 = scalar_lea.vmem %s53_s22, 256  ;;  %p324_p6 = scmp.lt.s32.totalorder %s53_s22, %s53_s22 }
  0x42   :  { %p320_p5 = scmp.ne.s32.totalorder %s53_s22, %s319_s7  ;;  %p325_p7 = scmp.lt.s32.totalorder %s319_s7, %s319_s7 }
  0x44   :  { %p326_p8 = por %p325_p7, %p324_p6 }
  0x46   :  { %p327_p9 = pnand %p326_p8, %p320_p5 }
  0x48   :  { %330 = shalt.err (!%p327_p9)
}
  0x49   :  { %55 = dma.hbm_to_vmem [thread:$0]  %s445_s3, 256, %s53_s22, [#allocation8]  }
  0x4a   :  { %331 = dma.done.wait [#allocation3], 256  }
  0x4b   :  { %332 = vsyncadd [#allocation3], 4294967040 }
  0x4c   :  { %333 = dma.done.wait [#allocation5], 512  }
  0x4d   :  { %334 = vsyncadd [#allocation5], 4294966784 }
  0x4e   :  { %335 = dma.done.wait [#allocation8], 256  }
  0x4f   :  { %336 = vsyncadd [#allocation8], 4294967040  ;;  %vm74_vm0 = vcmask 1024   ;;  %v341_v0 = vmov 0.0   ;;  %v80_v1 = vld [vmem:[#allocation6] sm:$0xff]  ;;  %v81_v2 = vld [vmem:[#allocation6 + $0x8] sm:$0xff]  ;;  %v151_v51 = vlaneseq }
  0x50   :  { %75 = vst.msk [vmem:[%s446_s4] sm:$0x3] %vm74_vm0, %v341_v0  ;;  %v90_v3 = vand.u32 2147483647, %v80_v1  ;;  %v91_v4 = vand.u32 2147483647, %v81_v2  ;;  %vm86_vm3 = vcmp.ne.f32.partialorder %v80_v1, %v80_v1  ;;  %vm87_vm4 = vcmp.ne.f32.partialorder %v81_v2, %v81_v2 }
  0x51   :  { %v84_v21 = vmax.f32 %v80_v1, 0.0  ;;  %v85_v24 = vmax.f32 %v81_v2, 0.0  ;;  %v76_v35 = vld [vmem:[#allocation2] sm:$0xff]  ;;  %v78_v36 = vld [vmem:[#allocation4] sm:$0xff]  ;;  %v77_v37 = vld [vmem:[#allocation2 + $0x8] sm:$0xff]  ;;  %v152_v58 = vshrl.u32 %v151_v51, 7 }
  0x52   :  { %v92_v5 = vsub.f32 0.0, %v90_v3  ;;  %v93_v6 = vsub.f32 0.0, %v91_v4  ;;  %v79_v38 = vld [vmem:[#allocation4 + $0x8] sm:$0xff]  ;;  %v128_v39 = vsub.f32 %v76_v35, %v78_v36  ;;  %v342_v49 = vmov 1983009808   ;;  %v82_v61 = vld [vmem:[#allocation7] sm:$0xff] }
  0x53   :  { %v129_v40 = vsub.f32 %v77_v37, %v79_v38  ;;  %v149_v50 = vunpack.c.l.s4 %v342_v49  ;;  %v83_v63 = vld [vmem:[#allocation7 + $0x8] sm:$0xff]  ;;  %vm189_vm5 = vcmask 1041408  }
  0x54   :  { %v94_v7 = vmul.f32 1.442695, %v92_v5  ;;  %v96_v8 = vmul.f32 1.442695, %v93_v6 }
  0x55   :  { %v150_v57 = vunpack.c.0.s8 %v149_v50 }
  0x56   :  { %224 = vpow2.f32 %v94_v7 }
  0x57   :  { %226 = vpow2.f32 %v96_v8 }
  0x60   :  { %v225_v9 = vpop.eup %224 }
  0x61   :  { %v227_v10 = vpop.eup %226  ;;  %v98_v11 = vadd.f32 1.0, %v225_v9  ;;  %v101_v13 = vmul.f32 -0.5, %v225_v9  ;;  %v104_v16 = vand.u32 2147483647, %v225_v9 }
  0x62   :  { %v107_v12 = vadd.f32 1.0, %v227_v10  ;;  %v110_v14 = vmul.f32 -0.5, %v227_v10  ;;  %v113_v18 = vand.u32 2147483647, %v227_v10 }
  0x63   :  { %228 = vlog2.f32 %v98_v11  ;;  %v102_v15 = vadd.f32 1.0, %v101_v13  ;;  %vm105_vm1 = vcmp.lt.f32.partialorder %v104_v16, 0.0004427343 }
  0x64   :  { %230 = vlog2.f32 %v107_v12  ;;  %v111_v17 = vadd.f32 1.0, %v110_v14  ;;  %vm114_vm2 = vcmp.lt.f32.partialorder %v113_v18, 0.0004427343 }
  0x65   :  { %v103_v19 = vmul.f32 %v225_v9, %v102_v15 }
  0x66   :  { %v112_v22 = vmul.f32 %v227_v10, %v111_v17 }
  0x6d   :  { %v229_v20 = vpop.eup %228 }
  0x6e   :  { %v231_v23 = vpop.eup %230  ;;  %v100_v25 = vmul.f32 0.6931472, %v229_v20 }
  0x6f   :  { %v109_v26 = vmul.f32 0.6931472, %v231_v23 }
  0x70   :  { %v106_v27 = vsel %vm105_vm1, %v103_v19, %v100_v25 }
  0x71   :  { %v115_v28 = vsel %vm114_vm2, %v112_v22, %v109_v26  ;;  %v116_v29 = vadd.f32 %v106_v27, %v84_v21 }
  0x72   :  { %v117_v30 = vadd.f32 %v115_v28, %v85_v24 }
  0x73   :  { %v118_v31 = vsel %vm86_vm3, %v80_v1, %v116_v29  ;;  %v153_v1 = vsub.s32 %v150_v57, %v152_v58 }
  0x74   :  { %v119_v32 = vsel %vm87_vm4, %v81_v2, %v117_v30  ;;  %v120_v33 = vmax.f32 %v118_v31, 0.01  ;;  %v142_v30 = vld [vmem:[%s446_s4] sm:$0x3] }
  0x75   :  { %v121_v34 = vmax.f32 %v119_v32, 0.01 }
  0x76   :  { %232 = vrcp.f32 %v120_v33 }
  0x77   :  { %234 = vrcp.f32 %v121_v34 }
  0x78   :  { %236 = vlog2.f32 %v120_v33 }
  0x79   :  { %238 = vlog2.f32 %v121_v34 }
  0x80   :  { %v233_v41 = vpop.eup %232 }
  0x81   :  { %v235_v42 = vpop.eup %234  ;;  %v130_v43 = vmul.f32 %v233_v41, %v128_v39 }
  0x82   :  { %v237_v44 = vpop.eup %236  ;;  %v131_v45 = vmul.f32 %v235_v42, %v129_v40 }
  0x83   :  { %v239_v46 = vpop.eup %238  ;;  %v125_v47 = vmul.f32 0.6931472, %v237_v44  ;;  %v132_v48 = vmul.f32 %v130_v43, %v130_v43 }
  0x84   :  { %v127_v52 = vmul.f32 0.6931472, %v239_v46  ;;  %v133_v53 = vmul.f32 %v131_v45, %v131_v45 }
  0x85   :  { %v134_v54 = vmul.f32 0.5, %v132_v48 }
  0x86   :  { %v135_v55 = vmul.f32 0.5, %v133_v53 }
  0x87   :  { %v136_v56 = vadd.f32 %v134_v54, %v125_v47 }
  0x88   :  { %v137_v59 = vadd.f32 %v135_v55, %v127_v52 }
  0x89   :  { %v138_v60 = vadd.f32 0.9189385, %v136_v56 }
  0x8a   :  { %v139_v62 = vadd.f32 0.9189385, %v137_v59 }
  0x8b   :  { %v140_v0 = vsub.f32 0.0, %v138_v60 }
  0x8c   :  { %v141_v2 = vsub.f32 0.0, %v139_v62 }
  0x8d   :  { %v143_v3 = vmul.f32 %v140_v0, %v82_v61 }
  0x8e   :  { %v144_v4 = vmul.f32 %v141_v2, %v83_v63 }
  0x8f   :  { %v147_v5 = vcombine.high %v143_v3, %v143_v3  ;;  %v154_v6 = vrot.slane %v143_v3, %v153_v1 }
  0x90   :  { %v164_v7 = vcombine.high %v144_v4, %v144_v4  ;;  %v171_v10 = vrot.slane %v144_v4, %v153_v1 }
  0x91   :  { %v161_v8 = vrot.slane %v147_v5, %v153_v1  ;;  %v162_v9 = vcombine.high %v154_v6, %v154_v6  ;;  %v190_v11 = vsel %vm189_vm5, %v154_v6, 0.0 }
  0x92   :  { %v178_v16 = vrot.slane %v164_v7, %v153_v1  ;;  %v179_v17 = vcombine.high %v171_v10, %v171_v10  ;;  %v197_v20 = vsel %vm189_vm5, %v171_v10, 0.0 }
  0x93   :  { %v163_v12 = vcombine.high %v161_v8, %v161_v8  ;;  %v191_v13 = vsel %vm189_vm5, %v162_v9, 0.0  ;;  %v193_v14 = vsel %vm189_vm5, %v161_v8, 0.0 }
  0x94   :  { %v192_v15 = vadd.f32 %v191_v13, %v190_v11  ;;  %v180_v22 = vcombine.high %v178_v16, %v178_v16  ;;  %v199_v23 = vsel %vm189_vm5, %v179_v17, 0.0  ;;  %v201_v25 = vsel %vm189_vm5, %v178_v16, 0.0 }
  0x95   :  { %v195_v18 = vsel %vm189_vm5, %v163_v12, 0.0 }
  0x96   :  { %v194_v19 = vadd.f32 %v193_v14, %v192_v15  ;;  %v203_v27 = vsel %vm189_vm5, %v180_v22, 0.0 }
  0x98   :  { %v196_v21 = vadd.f32 %v195_v18, %v194_v19 }
  0x9a   :  { %v198_v24 = vadd.f32 %v197_v20, %v196_v21 }
  0x9c   :  { %v200_v26 = vadd.f32 %v199_v23, %v198_v24 }
  0x9e   :  { %v202_v28 = vadd.f32 %v201_v25, %v200_v26 }
  0xa0   :  { %v204_v29 = vadd.f32 %v203_v27, %v202_v28 }
  0xa2   :  { %205 = vadd.xlane.f32.xlu0 %v204_v29 }
 0x12f   :  { %v206_v31 = vpop.xlane.xlu0 %205 }
 0x130   :  { %v207_v32 = vadd.f32 %v206_v31, %v142_v30 }
 0x132   :  { %209 = vst.msk [vmem:[%s446_s4] sm:$0x3] %vm74_vm0, %v207_v32 }
 0x133   :  { %214 = vsyncpa [#allocation3], 1 }
 0x134   :  { %215 = vsyncpa [#allocation5], 1 }
 0x135   :  { %216 = vsyncpa [#allocation8], 1 }

</bundles_post_ra>
